<compile_context>
chip_gen: v7x
topology: tpu7x:2x2x1
jax: 0.10.0
libtpu: 0.0.40
codegen_flags: <defaults>
</compile_context>

<pallas_src>
import functools

import jax
import jax.numpy as jnp
from jax import lax
from jax.experimental import pallas as pl
from jax.experimental.pallas import tpu as pltpu


def _self_attention_kernel(n_head,
                           x_q_ref, x_kv_ref,
                           wq_ref, bq_ref, wk_ref, bk_ref, wv_ref, bv_ref,
                           wo_ref, bo_ref, o_ref):
    # x_q_ref : (1, TQ, C_in)   query rows of this grid step
    # x_kv_ref: (1, L,  C_in)   full sequence (K/V source), resident per batch
    # wq/wk/wv: (H, C_in, dqk)  bf16 ; bq/bk/bv: (H, 1, dqk) f32
    # wo      : (H, dqk, out)   bf16 ; bo: (1, out) f32
    xq = x_q_ref[0].astype(jnp.bfloat16)       # (TQ, C_in)
    xkv = x_kv_ref[0].astype(jnp.bfloat16)     # (L,  C_in)

    tq = x_q_ref.shape[1]
    out_dim = o_ref.shape[2]
    acc = jnp.zeros((tq, out_dim), jnp.float32)

    # n_head is small & static: unrolled loop over leading-axis weight slices
    # (cheap), no lane-axis slicing of activations, no concat.
    # TODO(synk): for large n_head / very long L, switch to lax.fori_loop(unroll=True)
    # and a flash-style online softmax over K tiles.
    for h in range(n_head):
        q_h = jnp.dot(xq, wq_ref[h], preferred_element_type=jnp.float32) + bq_ref[h]   # (TQ, dqk)
        k_h = jnp.dot(xkv, wk_ref[h], preferred_element_type=jnp.float32) + bk_ref[h]  # (L,  dqk)
        v_h = jnp.dot(xkv, wv_ref[h], preferred_element_type=jnp.float32) + bv_ref[h]  # (L,  dqk)

        # scores: sim[i, j] = sum_c q[i, c] * k[j, c]   (no 1/sqrt(d) scaling, per reference)
        sim = lax.dot_general(q_h.astype(jnp.bfloat16), k_h.astype(jnp.bfloat16),
                              (((1,), (1,)), ((), ())),
                              preferred_element_type=jnp.float32)                      # (TQ, L)

        # softmax in f32
        sim = sim - jnp.max(sim, axis=-1, keepdims=True)
        e = jnp.exp(sim)
        attn = e * pl.reciprocal(jnp.sum(e, axis=-1, keepdims=True), approx=True)

        head = jnp.dot(attn.astype(jnp.bfloat16), v_h.astype(jnp.bfloat16),
                       preferred_element_type=jnp.float32)                             # (TQ, dqk)

        # fused fc_out: accumulate this head's contribution (no concat)
        acc = acc + jnp.dot(head.astype(jnp.bfloat16), wo_ref[h],
                            preferred_element_type=jnp.float32)                        # (TQ, out)

    o_ref[0] = (acc + bo_ref[...]).astype(o_ref.dtype)


def _pick_query_tile(L):
    """Largest convenient query tile: full L for short sequences, else a
    multiple-of-8 divisor capped at 256 (keeps (8,128) block rules happy)."""
    if L <= 256:
        return L
    for t in (256, 128, 64, 32, 16, 8):
        if L % t == 0:
            return t
    return L


def self_attention(x, params, *, n_head, qk_dim):
    """x: (B, L, C_in) float32.  Weights use jnp convention W:(in,out), y = x@W+b.
    Returns (B, L, out_dim)."""
    B, L, C_in = x.shape
    wq, bq, wk, bk, wv, bv, wo, bo = params
    total_qk = n_head * qk_dim
    assert wq.shape == (C_in, total_qk)
    out_dim = wo.shape[1]

    # ---- wrapper-side (free) per-head weight re-layout --------------------
    def split_w(w):    # (C_in, H*dqk) -> (H, C_in, dqk), bf16 for the MXU
        return w.reshape(C_in, n_head, qk_dim).transpose(1, 0, 2).astype(jnp.bfloat16)

    def split_b(b):    # (1, H*dqk) -> (H, 1, dqk), kept f32
        return b.reshape(n_head, 1, qk_dim)

    wq_h, wk_h, wv_h = split_w(wq), split_w(wk), split_w(wv)
    bq_h, bk_h, bv_h = split_b(bq), split_b(bk), split_b(bv)
    wo_h = wo.reshape(n_head, qk_dim, out_dim).astype(jnp.bfloat16)

    tq = _pick_query_tile(L)
    n_q = L // tq

    kernel = functools.partial(_self_attention_kernel, n_head)

    def const_spec(shape):
        return pl.BlockSpec(shape, lambda b, qi, _s=len(shape): (0,) * _s)

    # explicit VMEM budget: double-buffered blocks + bf16 weights + f32
    # intermediates, x4 headroom, clamped to [32 MiB, 48 MiB] so it leaves
    # headroom on v7x (64 MiB physical VMEM).
    blk_bytes = 4 * (2 * tq * C_in + 2 * L * C_in + 2 * tq * out_dim)
    w_bytes = 2 * 2 * n_head * (3 * C_in * qk_dim + qk_dim * out_dim)
    tmp_bytes = 4 * (2 * tq * L + (tq + 2 * L) * qk_dim + 2 * tq * out_dim)
    vmem_limit = int(min(max(4 * (blk_bytes + w_bytes + tmp_bytes), 32 << 20), 48 << 20))

    return pl.pallas_call(
        kernel,
        out_shape=jax.ShapeDtypeStruct((B, L, out_dim), x.dtype),
        grid_spec=pltpu.PrefetchScalarGridSpec(
            num_scalar_prefetch=0,
            grid=(B, n_q),
            in_specs=[
                pl.BlockSpec((1, tq, C_in), lambda b, qi: (b, qi, 0)),   # x (query rows)
                pl.BlockSpec((1, L, C_in), lambda b, qi: (b, 0, 0)),     # x (K/V source, resident per batch)
                const_spec((n_head, C_in, qk_dim)),                      # wq (per-head, bf16)
                const_spec((n_head, 1, qk_dim)),                         # bq
                const_spec((n_head, C_in, qk_dim)),                      # wk
                const_spec((n_head, 1, qk_dim)),                         # bk
                const_spec((n_head, C_in, qk_dim)),                      # wv
                const_spec((n_head, 1, qk_dim)),                         # bv
                const_spec((n_head, qk_dim, out_dim)),                   # wo (per-head, bf16)
                const_spec((1, out_dim)),                                # bo
            ],
            out_specs=pl.BlockSpec((1, tq, out_dim), lambda b, qi: (b, qi, 0)),
        ),
        compiler_params=pltpu.CompilerParams(
            dimension_semantics=("parallel", "parallel"),
            vmem_limit_bytes=vmem_limit),
    )(x, x, wq_h, bq_h, wk_h, bk_h, wv_h, bv_h, wo_h, bo)


def reference(x, params, *, n_head, qk_dim):
    """Pure-JAX f32 reference mirroring the PyTorch forward."""
    wq, bq, wk, bk, wv, bv, wo, bo = params
    B, L, _ = x.shape

    def proj(w, b):
        y = jnp.einsum('bld,dk->blk', x, w) + b[0]                        # (B, L, n*c)
        return y.reshape(B, L, n_head, qk_dim).transpose(0, 2, 3, 1)      # b n c l

    q = proj(wq, bq)
    k = proj(wk, bk)
    v = proj(wv, bv)
    sim = jnp.einsum('bnci,bncj->bnij', q, k)
    sim = sim - jnp.max(sim, axis=-1, keepdims=True)
    attn = jax.nn.softmax(sim, axis=-1)
    out = jnp.einsum('bnij,bncj->bnic', attn, v)                          # b n i c
    out = out.transpose(0, 2, 1, 3).reshape(B, L, n_head * qk_dim)        # b i (n c)
    return jnp.einsum('bld,do->blo', out, wo) + bo[0]


if __name__ == "__main__":
    # Small shapes consistent with the module.
    B, L = 2, 8
    in_dim, out_dim, qk_dim, n_head = 32, 16, 8, 4
    total_qk = qk_dim * n_head

    key = jax.random.PRNGKey(0)
    keys = jax.random.split(key, 9)

    x = jax.random.normal(keys[0], (B, L, in_dim), dtype=jnp.float32)

    def init_linear(kw, kb, fan_in, fan_out):
        lim = 1.0 / (fan_in ** 0.5)
        w = jax.random.uniform(kw, (fan_in, fan_out), jnp.float32, -lim, lim)
        b = jax.random.uniform(kb, (1, fan_out), jnp.float32, -lim, lim)
        return w, b

    wq, bq = init_linear(keys[1], keys[2], in_dim, total_qk)
    wk, bk = init_linear(keys[3], keys[4], in_dim, total_qk)
    wv, bv = init_linear(keys[5], keys[6], in_dim, total_qk)
    wo, bo = init_linear(keys[7], keys[8], total_qk, out_dim)
    params = (wq, bq, wk, bk, wv, bv, wo, bo)

    out = self_attention(x, params, n_head=n_head, qk_dim=qk_dim)
    out = jax.block_until_ready(out)

    ref = reference(x, params, n_head=n_head, qk_dim=qk_dim)
    assert out.shape == (B, L, out_dim)
    err = float(jnp.max(jnp.abs(out - ref)))
    # bf16 MXU inputs + approx reciprocal -> looser tolerance than the f32-only run.
    assert jnp.allclose(out, ref, atol=5e-2, rtol=5e-2), f"max abs err = {err}"

    print("KERNEL_OK")
</pallas_src>

<mosaic_0001>
module attributes {stable_mosaic.version = 11 : i64} {
  func.func @_self_attention_kernel(%arg0: i32, %arg1: i32, %arg2: memref<1x8x32xf32, #tpu.memory_space<vmem>>, %arg3: memref<1x8x32xf32, #tpu.memory_space<vmem>>, %arg4: memref<4x32x8xbf16, #tpu.memory_space<vmem>>, %arg5: memref<4x1x8xf32, #tpu.memory_space<vmem>>, %arg6: memref<4x32x8xbf16, #tpu.memory_space<vmem>>, %arg7: memref<4x1x8xf32, #tpu.memory_space<vmem>>, %arg8: memref<4x32x8xbf16, #tpu.memory_space<vmem>>, %arg9: memref<4x1x8xf32, #tpu.memory_space<vmem>>, %arg10: memref<4x8x16xbf16, #tpu.memory_space<vmem>>, %arg11: memref<1x16xf32, #tpu.memory_space<vmem>>, %arg12: memref<1x8x16xf32, #tpu.memory_space<vmem>>) attributes {dimension_semantics = [#tpu.dimension_semantics<parallel>, #tpu.dimension_semantics<parallel>], iteration_bounds = array<i64: 2, 1>, scalar_prefetch = 0 : i64, scratch_operands = 0 : i64, tpu.core_type = #tpu.core_type<tc>, window_params = [{transform_indices = @transform_0, window_bounds = array<i64: 1, 8, 32>}, {transform_indices = @transform_1, window_bounds = array<i64: 1, 8, 32>}, {pipeline_mode = #tpu.pipeline_mode<synchronous>, transform_indices = @transform_2, window_bounds = array<i64: 4, 32, 8>}, {pipeline_mode = #tpu.pipeline_mode<synchronous>, transform_indices = @transform_3, window_bounds = array<i64: 4, 1, 8>}, {pipeline_mode = #tpu.pipeline_mode<synchronous>, transform_indices = @transform_4, window_bounds = array<i64: 4, 32, 8>}, {pipeline_mode = #tpu.pipeline_mode<synchronous>, transform_indices = @transform_5, window_bounds = array<i64: 4, 1, 8>}, {pipeline_mode = #tpu.pipeline_mode<synchronous>, transform_indices = @transform_6, window_bounds = array<i64: 4, 32, 8>}, {pipeline_mode = #tpu.pipeline_mode<synchronous>, transform_indices = @transform_7, window_bounds = array<i64: 4, 1, 8>}, {pipeline_mode = #tpu.pipeline_mode<synchronous>, transform_indices = @transform_8, window_bounds = array<i64: 4, 8, 16>}, {pipeline_mode = #tpu.pipeline_mode<synchronous>, transform_indices = @transform_9, window_bounds = array<i64: 1, 16>}, {transform_indices = @transform_10, window_bounds = array<i64: 1, 8, 16>}]} {
    %c0 = arith.constant 0 : index
    %c0_0 = arith.constant 0 : index
    %c0_1 = arith.constant 0 : index
    %0 = vector.load %arg2[%c0, %c0_0, %c0_1] : memref<1x8x32xf32, #tpu.memory_space<vmem>>, vector<1x8x32xf32>
    %1 = vector.shape_cast %0 : vector<1x8x32xf32> to vector<8x32xf32>
    %2 = arith.truncf %1 : vector<8x32xf32> to vector<8x32xbf16>
    %c0_2 = arith.constant 0 : index
    %c0_3 = arith.constant 0 : index
    %c0_4 = arith.constant 0 : index
    %3 = vector.load %arg3[%c0_2, %c0_3, %c0_4] : memref<1x8x32xf32, #tpu.memory_space<vmem>>, vector<1x8x32xf32>
    %4 = vector.shape_cast %3 : vector<1x8x32xf32> to vector<8x32xf32>
    %5 = arith.truncf %4 : vector<8x32xf32> to vector<8x32xbf16>
    %cst = arith.constant 0.000000e+00 : f32
    %6 = vector.broadcast %cst : f32 to vector<8x16xf32>
    %c0_5 = arith.constant 0 : index
    %c0_6 = arith.constant 0 : index
    %c0_7 = arith.constant 0 : index
    %7 = vector.load %arg4[%c0_5, %c0_6, %c0_7] : memref<4x32x8xbf16, #tpu.memory_space<vmem>>, vector<1x32x8xbf16>
    %8 = vector.shape_cast %7 : vector<1x32x8xbf16> to vector<32x8xbf16>
    %cst_8 = arith.constant dense<0.000000e+00> : vector<8x8xf32>
    %9 = tpu.matmul %2, %8, %cst_8 {dimension_numbers = #tpu.dot_dimension_numbers<[1], [0], [0], [1], [0, 0, 1, 1], [], []>} : vector<8x32xbf16>, vector<32x8xbf16>, vector<8x8xf32> -> vector<8x8xf32>
    %c0_9 = arith.constant 0 : index
    %c0_10 = arith.constant 0 : index
    %c0_11 = arith.constant 0 : index
    %10 = vector.load %arg5[%c0_9, %c0_10, %c0_11] : memref<4x1x8xf32, #tpu.memory_space<vmem>>, vector<1x1x8xf32>
    %11 = vector.shape_cast %10 : vector<1x1x8xf32> to vector<1x8xf32>
    %12 = vector.broadcast %11 : vector<1x8xf32> to vector<8x8xf32>
    %13 = arith.addf %9, %12 : vector<8x8xf32>
    %c0_12 = arith.constant 0 : index
    %c0_13 = arith.constant 0 : index
    %c0_14 = arith.constant 0 : index
    %14 = vector.load %arg6[%c0_12, %c0_13, %c0_14] : memref<4x32x8xbf16, #tpu.memory_space<vmem>>, vector<1x32x8xbf16>
    %15 = vector.shape_cast %14 : vector<1x32x8xbf16> to vector<32x8xbf16>
    %cst_15 = arith.constant dense<0.000000e+00> : vector<8x8xf32>
    %16 = tpu.matmul %5, %15, %cst_15 {dimension_numbers = #tpu.dot_dimension_numbers<[1], [0], [0], [1], [0, 0, 1, 1], [], []>} : vector<8x32xbf16>, vector<32x8xbf16>, vector<8x8xf32> -> vector<8x8xf32>
    %c0_16 = arith.constant 0 : index
    %c0_17 = arith.constant 0 : index
    %c0_18 = arith.constant 0 : index
    %17 = vector.load %arg7[%c0_16, %c0_17, %c0_18] : memref<4x1x8xf32, #tpu.memory_space<vmem>>, vector<1x1x8xf32>
    %18 = vector.shape_cast %17 : vector<1x1x8xf32> to vector<1x8xf32>
    %19 = vector.broadcast %18 : vector<1x8xf32> to vector<8x8xf32>
    %20 = arith.addf %16, %19 : vector<8x8xf32>
    %c0_19 = arith.constant 0 : index
    %c0_20 = arith.constant 0 : index
    %c0_21 = arith.constant 0 : index
    %21 = vector.load %arg8[%c0_19, %c0_20, %c0_21] : memref<4x32x8xbf16, #tpu.memory_space<vmem>>, vector<1x32x8xbf16>
    %22 = vector.shape_cast %21 : vector<1x32x8xbf16> to vector<32x8xbf16>
    %cst_22 = arith.constant dense<0.000000e+00> : vector<8x8xf32>
    %23 = tpu.matmul %5, %22, %cst_22 {dimension_numbers = #tpu.dot_dimension_numbers<[1], [0], [0], [1], [0, 0, 1, 1], [], []>} : vector<8x32xbf16>, vector<32x8xbf16>, vector<8x8xf32> -> vector<8x8xf32>
    %c0_23 = arith.constant 0 : index
    %c0_24 = arith.constant 0 : index
    %c0_25 = arith.constant 0 : index
    %24 = vector.load %arg9[%c0_23, %c0_24, %c0_25] : memref<4x1x8xf32, #tpu.memory_space<vmem>>, vector<1x1x8xf32>
    %25 = vector.shape_cast %24 : vector<1x1x8xf32> to vector<1x8xf32>
    %26 = vector.broadcast %25 : vector<1x8xf32> to vector<8x8xf32>
    %27 = arith.addf %23, %26 : vector<8x8xf32>
    %28 = arith.truncf %13 : vector<8x8xf32> to vector<8x8xbf16>
    %29 = arith.truncf %20 : vector<8x8xf32> to vector<8x8xbf16>
    %cst_26 = arith.constant dense<0.000000e+00> : vector<8x8xf32>
    %30 = tpu.matmul %28, %29, %cst_26 {dimension_numbers = #tpu.dot_dimension_numbers<[1], [1], [0], [0], [0, 0, 1, 0], [], []>} : vector<8x8xbf16>, vector<8x8xbf16>, vector<8x8xf32> -> vector<8x8xf32>
    %cst_27 = arith.constant dense<0xFF800000> : vector<8xf32>
    %31 = vector.multi_reduction <maximumf>, %30, %cst_27 [1] : vector<8x8xf32> to vector<8xf32>
    %32 = vector.shape_cast %31 : vector<8xf32> to vector<8x1xf32>
    %33 = vector.broadcast %32 : vector<8x1xf32> to vector<8x8xf32>
    %34 = arith.subf %30, %33 : vector<8x8xf32>
    %35 = math.exp %34 : vector<8x8xf32>
    %cst_28 = arith.constant dense<0.000000e+00> : vector<8xf32>
    %36 = vector.multi_reduction <add>, %35, %cst_28 [1] : vector<8x8xf32> to vector<8xf32>
    %37 = vector.shape_cast %36 : vector<8xf32> to vector<8x1xf32>
    %38 = tpu.reciprocal %37 {approx = true} : vector<8x1xf32> -> vector<8x1xf32>
    %39 = vector.broadcast %38 : vector<8x1xf32> to vector<8x8xf32>
    %40 = arith.mulf %35, %39 : vector<8x8xf32>
    %41 = arith.truncf %40 : vector<8x8xf32> to vector<8x8xbf16>
    %42 = arith.truncf %27 : vector<8x8xf32> to vector<8x8xbf16>
    %cst_29 = arith.constant dense<0.000000e+00> : vector<8x8xf32>
    %43 = tpu.matmul %41, %42, %cst_29 {dimension_numbers = #tpu.dot_dimension_numbers<[1], [0], [0], [1], [0, 0, 1, 1], [], []>} : vector<8x8xbf16>, vector<8x8xbf16>, vector<8x8xf32> -> vector<8x8xf32>
    %44 = arith.truncf %43 : vector<8x8xf32> to vector<8x8xbf16>
    %c0_30 = arith.constant 0 : index
    %c0_31 = arith.constant 0 : index
    %c0_32 = arith.constant 0 : index
    %45 = vector.load %arg10[%c0_30, %c0_31, %c0_32] : memref<4x8x16xbf16, #tpu.memory_space<vmem>>, vector<1x8x16xbf16>
    %46 = vector.shape_cast %45 : vector<1x8x16xbf16> to vector<8x16xbf16>
    %cst_33 = arith.constant dense<0.000000e+00> : vector<8x16xf32>
    %47 = tpu.matmul %44, %46, %cst_33 {dimension_numbers = #tpu.dot_dimension_numbers<[1], [0], [0], [1], [0, 0, 1, 1], [], []>} : vector<8x8xbf16>, vector<8x16xbf16>, vector<8x16xf32> -> vector<8x16xf32>
    %48 = arith.addf %6, %47 : vector<8x16xf32>
    %c1 = arith.constant 1 : index
    %c0_34 = arith.constant 0 : index
    %c0_35 = arith.constant 0 : index
    %49 = vector.load %arg4[%c1, %c0_34, %c0_35] : memref<4x32x8xbf16, #tpu.memory_space<vmem>>, vector<1x32x8xbf16>
    %50 = vector.shape_cast %49 : vector<1x32x8xbf16> to vector<32x8xbf16>
    %cst_36 = arith.constant dense<0.000000e+00> : vector<8x8xf32>
    %51 = tpu.matmul %2, %50, %cst_36 {dimension_numbers = #tpu.dot_dimension_numbers<[1], [0], [0], [1], [0, 0, 1, 1], [], []>} : vector<8x32xbf16>, vector<32x8xbf16>, vector<8x8xf32> -> vector<8x8xf32>
    %c1_37 = arith.constant 1 : index
    %c0_38 = arith.constant 0 : index
    %c0_39 = arith.constant 0 : index
    %52 = vector.load %arg5[%c1_37, %c0_38, %c0_39] : memref<4x1x8xf32, #tpu.memory_space<vmem>>, vector<1x1x8xf32>
    %53 = vector.shape_cast %52 : vector<1x1x8xf32> to vector<1x8xf32>
    %54 = vector.broadcast %53 : vector<1x8xf32> to vector<8x8xf32>
    %55 = arith.addf %51, %54 : vector<8x8xf32>
    %c1_40 = arith.constant 1 : index
    %c0_41 = arith.constant 0 : index
    %c0_42 = arith.constant 0 : index
    %56 = vector.load %arg6[%c1_40, %c0_41, %c0_42] : memref<4x32x8xbf16, #tpu.memory_space<vmem>>, vector<1x32x8xbf16>
    %57 = vector.shape_cast %56 : vector<1x32x8xbf16> to vector<32x8xbf16>
    %cst_43 = arith.constant dense<0.000000e+00> : vector<8x8xf32>
    %58 = tpu.matmul %5, %57, %cst_43 {dimension_numbers = #tpu.dot_dimension_numbers<[1], [0], [0], [1], [0, 0, 1, 1], [], []>} : vector<8x32xbf16>, vector<32x8xbf16>, vector<8x8xf32> -> vector<8x8xf32>
    %c1_44 = arith.constant 1 : index
    %c0_45 = arith.constant 0 : index
    %c0_46 = arith.constant 0 : index
    %59 = vector.load %arg7[%c1_44, %c0_45, %c0_46] : memref<4x1x8xf32, #tpu.memory_space<vmem>>, vector<1x1x8xf32>
    %60 = vector.shape_cast %59 : vector<1x1x8xf32> to vector<1x8xf32>
    %61 = vector.broadcast %60 : vector<1x8xf32> to vector<8x8xf32>
    %62 = arith.addf %58, %61 : vector<8x8xf32>
    %c1_47 = arith.constant 1 : index
    %c0_48 = arith.constant 0 : index
    %c0_49 = arith.constant 0 : index
    %63 = vector.load %arg8[%c1_47, %c0_48, %c0_49] : memref<4x32x8xbf16, #tpu.memory_space<vmem>>, vector<1x32x8xbf16>
    %64 = vector.shape_cast %63 : vector<1x32x8xbf16> to vector<32x8xbf16>
    %cst_50 = arith.constant dense<0.000000e+00> : vector<8x8xf32>
    %65 = tpu.matmul %5, %64, %cst_50 {dimension_numbers = #tpu.dot_dimension_numbers<[1], [0], [0], [1], [0, 0, 1, 1], [], []>} : vector<8x32xbf16>, vector<32x8xbf16>, vector<8x8xf32> -> vector<8x8xf32>
    %c1_51 = arith.constant 1 : index
    %c0_52 = arith.constant 0 : index
    %c0_53 = arith.constant 0 : index
    %66 = vector.load %arg9[%c1_51, %c0_52, %c0_53] : memref<4x1x8xf32, #tpu.memory_space<vmem>>, vector<1x1x8xf32>
    %67 = vector.shape_cast %66 : vector<1x1x8xf32> to vector<1x8xf32>
    %68 = vector.broadcast %67 : vector<1x8xf32> to vector<8x8xf32>
    %69 = arith.addf %65, %68 : vector<8x8xf32>
    %70 = arith.truncf %55 : vector<8x8xf32> to vector<8x8xbf16>
    %71 = arith.truncf %62 : vector<8x8xf32> to vector<8x8xbf16>
    %cst_54 = arith.constant dense<0.000000e+00> : vector<8x8xf32>
    %72 = tpu.matmul %70, %71, %cst_54 {dimension_numbers = #tpu.dot_dimension_numbers<[1], [1], [0], [0], [0, 0, 1, 0], [], []>} : vector<8x8xbf16>, vector<8x8xbf16>, vector<8x8xf32> -> vector<8x8xf32>
    %cst_55 = arith.constant dense<0xFF800000> : vector<8xf32>
    %73 = vector.multi_reduction <maximumf>, %72, %cst_55 [1] : vector<8x8xf32> to vector<8xf32>
    %74 = vector.shape_cast %73 : vector<8xf32> to vector<8x1xf32>
    %75 = vector.broadcast %74 : vector<8x1xf32> to vector<8x8xf32>
    %76 = arith.subf %72, %75 : vector<8x8xf32>
    %77 = math.exp %76 : vector<8x8xf32>
    %cst_56 = arith.constant dense<0.000000e+00> : vector<8xf32>
    %78 = vector.multi_reduction <add>, %77, %cst_56 [1] : vector<8x8xf32> to vector<8xf32>
    %79 = vector.shape_cast %78 : vector<8xf32> to vector<8x1xf32>
    %80 = tpu.reciprocal %79 {approx = true} : vector<8x1xf32> -> vector<8x1xf32>
    %81 = vector.broadcast %80 : vector<8x1xf32> to vector<8x8xf32>
    %82 = arith.mulf %77, %81 : vector<8x8xf32>
    %83 = arith.truncf %82 : vector<8x8xf32> to vector<8x8xbf16>
    %84 = arith.truncf %69 : vector<8x8xf32> to vector<8x8xbf16>
    %cst_57 = arith.constant dense<0.000000e+00> : vector<8x8xf32>
    %85 = tpu.matmul %83, %84, %cst_57 {dimension_numbers = #tpu.dot_dimension_numbers<[1], [0], [0], [1], [0, 0, 1, 1], [], []>} : vector<8x8xbf16>, vector<8x8xbf16>, vector<8x8xf32> -> vector<8x8xf32>
    %86 = arith.truncf %85 : vector<8x8xf32> to vector<8x8xbf16>
    %c1_58 = arith.constant 1 : index
    %c0_59 = arith.constant 0 : index
    %c0_60 = arith.constant 0 : index
    %87 = vector.load %arg10[%c1_58, %c0_59, %c0_60] : memref<4x8x16xbf16, #tpu.memory_space<vmem>>, vector<1x8x16xbf16>
    %88 = vector.shape_cast %87 : vector<1x8x16xbf16> to vector<8x16xbf16>
    %cst_61 = arith.constant dense<0.000000e+00> : vector<8x16xf32>
    %89 = tpu.matmul %86, %88, %cst_61 {dimension_numbers = #tpu.dot_dimension_numbers<[1], [0], [0], [1], [0, 0, 1, 1], [], []>} : vector<8x8xbf16>, vector<8x16xbf16>, vector<8x16xf32> -> vector<8x16xf32>
    %90 = arith.addf %48, %89 : vector<8x16xf32>
    %c2 = arith.constant 2 : index
    %c0_62 = arith.constant 0 : index
    %c0_63 = arith.constant 0 : index
    %91 = vector.load %arg4[%c2, %c0_62, %c0_63] : memref<4x32x8xbf16, #tpu.memory_space<vmem>>, vector<1x32x8xbf16>
    %92 = vector.shape_cast %91 : vector<1x32x8xbf16> to vector<32x8xbf16>
    %cst_64 = arith.constant dense<0.000000e+00> : vector<8x8xf32>
    %93 = tpu.matmul %2, %92, %cst_64 {dimension_numbers = #tpu.dot_dimension_numbers<[1], [0], [0], [1], [0, 0, 1, 1], [], []>} : vector<8x32xbf16>, vector<32x8xbf16>, vector<8x8xf32> -> vector<8x8xf32>
    %c2_65 = arith.constant 2 : index
    %c0_66 = arith.constant 0 : index
    %c0_67 = arith.constant 0 : index
    %94 = vector.load %arg5[%c2_65, %c0_66, %c0_67] : memref<4x1x8xf32, #tpu.memory_space<vmem>>, vector<1x1x8xf32>
    %95 = vector.shape_cast %94 : vector<1x1x8xf32> to vector<1x8xf32>
    %96 = vector.broadcast %95 : vector<1x8xf32> to vector<8x8xf32>
    %97 = arith.addf %93, %96 : vector<8x8xf32>
    %c2_68 = arith.constant 2 : index
    %c0_69 = arith.constant 0 : index
    %c0_70 = arith.constant 0 : index
    %98 = vector.load %arg6[%c2_68, %c0_69, %c0_70] : memref<4x32x8xbf16, #tpu.memory_space<vmem>>, vector<1x32x8xbf16>
    %99 = vector.shape_cast %98 : vector<1x32x8xbf16> to vector<32x8xbf16>
    %cst_71 = arith.constant dense<0.000000e+00> : vector<8x8xf32>
    %100 = tpu.matmul %5, %99, %cst_71 {dimension_numbers = #tpu.dot_dimension_numbers<[1], [0], [0], [1], [0, 0, 1, 1], [], []>} : vector<8x32xbf16>, vector<32x8xbf16>, vector<8x8xf32> -> vector<8x8xf32>
    %c2_72 = arith.constant 2 : index
    %c0_73 = arith.constant 0 : index
    %c0_74 = arith.constant 0 : index
    %101 = vector.load %arg7[%c2_72, %c0_73, %c0_74] : memref<4x1x8xf32, #tpu.memory_space<vmem>>, vector<1x1x8xf32>
    %102 = vector.shape_cast %101 : vector<1x1x8xf32> to vector<1x8xf32>
    %103 = vector.broadcast %102 : vector<1x8xf32> to vector<8x8xf32>
    %104 = arith.addf %100, %103 : vector<8x8xf32>
    %c2_75 = arith.constant 2 : index
    %c0_76 = arith.constant 0 : index
    %c0_77 = arith.constant 0 : index
    %105 = vector.load %arg8[%c2_75, %c0_76, %c0_77] : memref<4x32x8xbf16, #tpu.memory_space<vmem>>, vector<1x32x8xbf16>
    %106 = vector.shape_cast %105 : vector<1x32x8xbf16> to vector<32x8xbf16>
    %cst_78 = arith.constant dense<0.000000e+00> : vector<8x8xf32>
    %107 = tpu.matmul %5, %106, %cst_78 {dimension_numbers = #tpu.dot_dimension_numbers<[1], [0], [0], [1], [0, 0, 1, 1], [], []>} : vector<8x32xbf16>, vector<32x8xbf16>, vector<8x8xf32> -> vector<8x8xf32>
    %c2_79 = arith.constant 2 : index
    %c0_80 = arith.constant 0 : index
    %c0_81 = arith.constant 0 : index
    %108 = vector.load %arg9[%c2_79, %c0_80, %c0_81] : memref<4x1x8xf32, #tpu.memory_space<vmem>>, vector<1x1x8xf32>
    %109 = vector.shape_cast %108 : vector<1x1x8xf32> to vector<1x8xf32>
    %110 = vector.broadcast %109 : vector<1x8xf32> to vector<8x8xf32>
    %111 = arith.addf %107, %110 : vector<8x8xf32>
    %112 = arith.truncf %97 : vector<8x8xf32> to vector<8x8xbf16>
    %113 = arith.truncf %104 : vector<8x8xf32> to vector<8x8xbf16>
    %cst_82 = arith.constant dense<0.000000e+00> : vector<8x8xf32>
    %114 = tpu.matmul %112, %113, %cst_82 {dimension_numbers = #tpu.dot_dimension_numbers<[1], [1], [0], [0], [0, 0, 1, 0], [], []>} : vector<8x8xbf16>, vector<8x8xbf16>, vector<8x8xf32> -> vector<8x8xf32>
    %cst_83 = arith.constant dense<0xFF800000> : vector<8xf32>
    %115 = vector.multi_reduction <maximumf>, %114, %cst_83 [1] : vector<8x8xf32> to vector<8xf32>
    %116 = vector.shape_cast %115 : vector<8xf32> to vector<8x1xf32>
    %117 = vector.broadcast %116 : vector<8x1xf32> to vector<8x8xf32>
    %118 = arith.subf %114, %117 : vector<8x8xf32>
    %119 = math.exp %118 : vector<8x8xf32>
    %cst_84 = arith.constant dense<0.000000e+00> : vector<8xf32>
    %120 = vector.multi_reduction <add>, %119, %cst_84 [1] : vector<8x8xf32> to vector<8xf32>
    %121 = vector.shape_cast %120 : vector<8xf32> to vector<8x1xf32>
    %122 = tpu.reciprocal %121 {approx = true} : vector<8x1xf32> -> vector<8x1xf32>
    %123 = vector.broadcast %122 : vector<8x1xf32> to vector<8x8xf32>
    %124 = arith.mulf %119, %123 : vector<8x8xf32>
    %125 = arith.truncf %124 : vector<8x8xf32> to vector<8x8xbf16>
    %126 = arith.truncf %111 : vector<8x8xf32> to vector<8x8xbf16>
    %cst_85 = arith.constant dense<0.000000e+00> : vector<8x8xf32>
    %127 = tpu.matmul %125, %126, %cst_85 {dimension_numbers = #tpu.dot_dimension_numbers<[1], [0], [0], [1], [0, 0, 1, 1], [], []>} : vector<8x8xbf16>, vector<8x8xbf16>, vector<8x8xf32> -> vector<8x8xf32>
    %128 = arith.truncf %127 : vector<8x8xf32> to vector<8x8xbf16>
    %c2_86 = arith.constant 2 : index
    %c0_87 = arith.constant 0 : index
    %c0_88 = arith.constant 0 : index
    %129 = vector.load %arg10[%c2_86, %c0_87, %c0_88] : memref<4x8x16xbf16, #tpu.memory_space<vmem>>, vector<1x8x16xbf16>
    %130 = vector.shape_cast %129 : vector<1x8x16xbf16> to vector<8x16xbf16>
    %cst_89 = arith.constant dense<0.000000e+00> : vector<8x16xf32>
    %131 = tpu.matmul %128, %130, %cst_89 {dimension_numbers = #tpu.dot_dimension_numbers<[1], [0], [0], [1], [0, 0, 1, 1], [], []>} : vector<8x8xbf16>, vector<8x16xbf16>, vector<8x16xf32> -> vector<8x16xf32>
    %132 = arith.addf %90, %131 : vector<8x16xf32>
    %c3 = arith.constant 3 : index
    %c0_90 = arith.constant 0 : index
    %c0_91 = arith.constant 0 : index
    %133 = vector.load %arg4[%c3, %c0_90, %c0_91] : memref<4x32x8xbf16, #tpu.memory_space<vmem>>, vector<1x32x8xbf16>
    %134 = vector.shape_cast %133 : vector<1x32x8xbf16> to vector<32x8xbf16>
    %cst_92 = arith.constant dense<0.000000e+00> : vector<8x8xf32>
    %135 = tpu.matmul %2, %134, %cst_92 {dimension_numbers = #tpu.dot_dimension_numbers<[1], [0], [0], [1], [0, 0, 1, 1], [], []>} : vector<8x32xbf16>, vector<32x8xbf16>, vector<8x8xf32> -> vector<8x8xf32>
    %c3_93 = arith.constant 3 : index
    %c0_94 = arith.constant 0 : index
    %c0_95 = arith.constant 0 : index
    %136 = vector.load %arg5[%c3_93, %c0_94, %c0_95] : memref<4x1x8xf32, #tpu.memory_space<vmem>>, vector<1x1x8xf32>
    %137 = vector.shape_cast %136 : vector<1x1x8xf32> to vector<1x8xf32>
    %138 = vector.broadcast %137 : vector<1x8xf32> to vector<8x8xf32>
    %139 = arith.addf %135, %138 : vector<8x8xf32>
    %c3_96 = arith.constant 3 : index
    %c0_97 = arith.constant 0 : index
    %c0_98 = arith.constant 0 : index
    %140 = vector.load %arg6[%c3_96, %c0_97, %c0_98] : memref<4x32x8xbf16, #tpu.memory_space<vmem>>, vector<1x32x8xbf16>
    %141 = vector.shape_cast %140 : vector<1x32x8xbf16> to vector<32x8xbf16>
    %cst_99 = arith.constant dense<0.000000e+00> : vector<8x8xf32>
    %142 = tpu.matmul %5, %141, %cst_99 {dimension_numbers = #tpu.dot_dimension_numbers<[1], [0], [0], [1], [0, 0, 1, 1], [], []>} : vector<8x32xbf16>, vector<32x8xbf16>, vector<8x8xf32> -> vector<8x8xf32>
    %c3_100 = arith.constant 3 : index
    %c0_101 = arith.constant 0 : index
    %c0_102 = arith.constant 0 : index
    %143 = vector.load %arg7[%c3_100, %c0_101, %c0_102] : memref<4x1x8xf32, #tpu.memory_space<vmem>>, vector<1x1x8xf32>
    %144 = vector.shape_cast %143 : vector<1x1x8xf32> to vector<1x8xf32>
    %145 = vector.broadcast %144 : vector<1x8xf32> to vector<8x8xf32>
    %146 = arith.addf %142, %145 : vector<8x8xf32>
    %c3_103 = arith.constant 3 : index
    %c0_104 = arith.constant 0 : index
    %c0_105 = arith.constant 0 : index
    %147 = vector.load %arg8[%c3_103, %c0_104, %c0_105] : memref<4x32x8xbf16, #tpu.memory_space<vmem>>, vector<1x32x8xbf16>
    %148 = vector.shape_cast %147 : vector<1x32x8xbf16> to vector<32x8xbf16>
    %cst_106 = arith.constant dense<0.000000e+00> : vector<8x8xf32>
    %149 = tpu.matmul %5, %148, %cst_106 {dimension_numbers = #tpu.dot_dimension_numbers<[1], [0], [0], [1], [0, 0, 1, 1], [], []>} : vector<8x32xbf16>, vector<32x8xbf16>, vector<8x8xf32> -> vector<8x8xf32>
    %c3_107 = arith.constant 3 : index
    %c0_108 = arith.constant 0 : index
    %c0_109 = arith.constant 0 : index
    %150 = vector.load %arg9[%c3_107, %c0_108, %c0_109] : memref<4x1x8xf32, #tpu.memory_space<vmem>>, vector<1x1x8xf32>
    %151 = vector.shape_cast %150 : vector<1x1x8xf32> to vector<1x8xf32>
    %152 = vector.broadcast %151 : vector<1x8xf32> to vector<8x8xf32>
    %153 = arith.addf %149, %152 : vector<8x8xf32>
    %154 = arith.truncf %139 : vector<8x8xf32> to vector<8x8xbf16>
    %155 = arith.truncf %146 : vector<8x8xf32> to vector<8x8xbf16>
    %cst_110 = arith.constant dense<0.000000e+00> : vector<8x8xf32>
    %156 = tpu.matmul %154, %155, %cst_110 {dimension_numbers = #tpu.dot_dimension_numbers<[1], [1], [0], [0], [0, 0, 1, 0], [], []>} : vector<8x8xbf16>, vector<8x8xbf16>, vector<8x8xf32> -> vector<8x8xf32>
    %cst_111 = arith.constant dense<0xFF800000> : vector<8xf32>
    %157 = vector.multi_reduction <maximumf>, %156, %cst_111 [1] : vector<8x8xf32> to vector<8xf32>
    %158 = vector.shape_cast %157 : vector<8xf32> to vector<8x1xf32>
    %159 = vector.broadcast %158 : vector<8x1xf32> to vector<8x8xf32>
    %160 = arith.subf %156, %159 : vector<8x8xf32>
    %161 = math.exp %160 : vector<8x8xf32>
    %cst_112 = arith.constant dense<0.000000e+00> : vector<8xf32>
    %162 = vector.multi_reduction <add>, %161, %cst_112 [1] : vector<8x8xf32> to vector<8xf32>
    %163 = vector.shape_cast %162 : vector<8xf32> to vector<8x1xf32>
    %164 = tpu.reciprocal %163 {approx = true} : vector<8x1xf32> -> vector<8x1xf32>
    %165 = vector.broadcast %164 : vector<8x1xf32> to vector<8x8xf32>
    %166 = arith.mulf %161, %165 : vector<8x8xf32>
    %167 = arith.truncf %166 : vector<8x8xf32> to vector<8x8xbf16>
    %168 = arith.truncf %153 : vector<8x8xf32> to vector<8x8xbf16>
    %cst_113 = arith.constant dense<0.000000e+00> : vector<8x8xf32>
    %169 = tpu.matmul %167, %168, %cst_113 {dimension_numbers = #tpu.dot_dimension_numbers<[1], [0], [0], [1], [0, 0, 1, 1], [], []>} : vector<8x8xbf16>, vector<8x8xbf16>, vector<8x8xf32> -> vector<8x8xf32>
    %170 = arith.truncf %169 : vector<8x8xf32> to vector<8x8xbf16>
    %c3_114 = arith.constant 3 : index
    %c0_115 = arith.constant 0 : index
    %c0_116 = arith.constant 0 : index
    %171 = vector.load %arg10[%c3_114, %c0_115, %c0_116] : memref<4x8x16xbf16, #tpu.memory_space<vmem>>, vector<1x8x16xbf16>
    %172 = vector.shape_cast %171 : vector<1x8x16xbf16> to vector<8x16xbf16>
    %cst_117 = arith.constant dense<0.000000e+00> : vector<8x16xf32>
    %173 = tpu.matmul %170, %172, %cst_117 {dimension_numbers = #tpu.dot_dimension_numbers<[1], [0], [0], [1], [0, 0, 1, 1], [], []>} : vector<8x8xbf16>, vector<8x16xbf16>, vector<8x16xf32> -> vector<8x16xf32>
    %174 = arith.addf %132, %173 : vector<8x16xf32>
    %c0_118 = arith.constant 0 : index
    %c0_119 = arith.constant 0 : index
    %175 = vector.load %arg11[%c0_118, %c0_119] : memref<1x16xf32, #tpu.memory_space<vmem>>, vector<1x16xf32>
    %176 = vector.broadcast %175 : vector<1x16xf32> to vector<8x16xf32>
    %177 = arith.addf %174, %176 : vector<8x16xf32>
    %c0_120 = arith.constant 0 : index
    %c0_121 = arith.constant 0 : index
    %c0_122 = arith.constant 0 : index
    %178 = vector.load %arg12[%c0_120, %c0_121, %c0_122] : memref<1x8x16xf32, #tpu.memory_space<vmem>>, vector<1x8x16xf32>
    %179 = vector.shape_cast %178 : vector<1x8x16xf32> to vector<8x16xf32>
    %180 = vector.shape_cast %177 : vector<8x16xf32> to vector<1x8x16xf32>
    tpu.vector_store %arg12[%c0_120, %c0_121, %c0_122], %180 {strides = array<i32>} : memref<1x8x16xf32, #tpu.memory_space<vmem>>, vector<1x8x16xf32>,
    return
  }
  func.func @transform_0(%arg0: i32, %arg1: i32) -> (i32, i32, i32) {
    %c0_i32 = arith.constant 0 : i32
    %c0_i32_0 = arith.constant 0 : i32
    return %arg0, %arg1, %c0_i32 : i32, i32, i32
  }
  func.func @transform_1(%arg0: i32, %arg1: i32) -> (i32, i32, i32) {
    %c0_i32 = arith.constant 0 : i32
    %c0_i32_0 = arith.constant 0 : i32
    %c0_i32_1 = arith.constant 0 : i32
    return %arg0, %c0_i32, %c0_i32_0 : i32, i32, i32
  }
  func.func @transform_2(%arg0: i32, %arg1: i32) -> (i32, i32, i32) {
    %c0_i32 = arith.constant 0 : i32
    %c0_i32_0 = arith.constant 0 : i32
    %c0_i32_1 = arith.constant 0 : i32
    %c0_i32_2 = arith.constant 0 : i32
    return %c0_i32, %c0_i32_0, %c0_i32_1 : i32, i32, i32
  }
  func.func @transform_3(%arg0: i32, %arg1: i32) -> (i32, i32, i32) {
    %c0_i32 = arith.constant 0 : i32
    %c0_i32_0 = arith.constant 0 : i32
    %c0_i32_1 = arith.constant 0 : i32
    %c0_i32_2 = arith.constant 0 : i32
    return %c0_i32, %c0_i32_0, %c0_i32_1 : i32, i32, i32
  }
  func.func @transform_4(%arg0: i32, %arg1: i32) -> (i32, i32, i32) {
    %c0_i32 = arith.constant 0 : i32
    %c0_i32_0 = arith.constant 0 : i32
    %c0_i32_1 = arith.constant 0 : i32
    %c0_i32_2 = arith.constant 0 : i32
    return %c0_i32, %c0_i32_0, %c0_i32_1 : i32, i32, i32
  }
  func.func @transform_5(%arg0: i32, %arg1: i32) -> (i32, i32, i32) {
    %c0_i32 = arith.constant 0 : i32
    %c0_i32_0 = arith.constant 0 : i32
    %c0_i32_1 = arith.constant 0 : i32
    %c0_i32_2 = arith.constant 0 : i32
    return %c0_i32, %c0_i32_0, %c0_i32_1 : i32, i32, i32
  }
  func.func @transform_6(%arg0: i32, %arg1: i32) -> (i32, i32, i32) {
    %c0_i32 = arith.constant 0 : i32
    %c0_i32_0 = arith.constant 0 : i32
    %c0_i32_1 = arith.constant 0 : i32
    %c0_i32_2 = arith.constant 0 : i32
    return %c0_i32, %c0_i32_0, %c0_i32_1 : i32, i32, i32
  }
  func.func @transform_7(%arg0: i32, %arg1: i32) -> (i32, i32, i32) {
    %c0_i32 = arith.constant 0 : i32
    %c0_i32_0 = arith.constant 0 : i32
    %c0_i32_1 = arith.constant 0 : i32
    %c0_i32_2 = arith.constant 0 : i32
    return %c0_i32, %c0_i32_0, %c0_i32_1 : i32, i32, i32
  }
  func.func @transform_8(%arg0: i32, %arg1: i32) -> (i32, i32, i32) {
    %c0_i32 = arith.constant 0 : i32
    %c0_i32_0 = arith.constant 0 : i32
    %c0_i32_1 = arith.constant 0 : i32
    %c0_i32_2 = arith.constant 0 : i32
    return %c0_i32, %c0_i32_0, %c0_i32_1 : i32, i32, i32
  }
  func.func @transform_9(%arg0: i32, %arg1: i32) -> (i32, i32) {
    %c0_i32 = arith.constant 0 : i32
    %c0_i32_0 = arith.constant 0 : i32
    %c0_i32_1 = arith.constant 0 : i32
    return %c0_i32, %c0_i32_0 : i32, i32
  }
  func.func @transform_10(%arg0: i32, %arg1: i32) -> (i32, i32, i32) {
    %c0_i32 = arith.constant 0 : i32
    %c0_i32_0 = arith.constant 0 : i32
    return %arg0, %arg1, %c0_i32 : i32, i32, i32
  }
}

</mosaic_0001>

<bundles_post_ra>
// kernel: tpu_custom_call.1
= control target key start
LH: loop header
LB: loop body
LE: loop exit
PB: predicated region body
PF: predicated region fallthrough
CT: control target
= control target key end

     0   :  { %s2894_s0 = inlined_call_operand.vmem [shape: f32[2,8,32], index: 0, kind: input, shape index: {}]   ;;  %s2895_s1 = inlined_call_operand.vmem [shape: f32[2,8,32], index: 1, kind: input, shape index: {}]   ;;  %s2896_s2 = inlined_call_operand.vmem [shape: bf16[4,32,8], index: 2, kind: input, shape index: {}]   ;;  %s2897_s3 = inlined_call_operand.vmem [shape: f32[4,1,8], index: 3, kind: input, shape index: {}]   ;;  %s2898_s4 = inlined_call_operand.vmem [shape: bf16[4,32,8], index: 4, kind: input, shape index: {}]   ;;  %s2899_s5 = inlined_call_operand.vmem [shape: f32[4,1,8], index: 5, kind: input, shape index: {}]   ;;  %s2900_s6 = inlined_call_operand.vmem [shape: bf16[4,32,8], index: 6, kind: input, shape index: {}]   ;;  %s2901_s7 = inlined_call_operand.vmem [shape: f32[4,1,8], index: 7, kind: input, shape index: {}]   ;;  %s2902_s8 = inlined_call_operand.vmem [shape: bf16[4,8,16], index: 8, kind: input, shape index: {}]   ;;  %s2903_s9 = inlined_call_operand.vmem [shape: f32[1,16], index: 9, kind: input, shape index: {}]   ;;  %s2904_s10 = inlined_call_operand.hbm [shape: f32[2,8,16], index: 10, kind: output, shape index: {}]  }
   0x1   :  { %2905 = sst [smem:[#allocation5_spill]] %s2894_s0 }
   0x2   :  { %15 = vsyncpa [#allocation3], 0 }
   0x3   :  { %17 = vsyncpa [#allocation3 + $0x1], 0  ;;  %s2502_s13 = smov 0   ;;  %s2504_s14 = smov 0  }
   0x4   :  { %s2506_s15 = smov 0   ;;  %s2508_s16 = smov 0  }
   0x5   :  { %s2510_s17 = smov 0   ;;  %s2512_s18 = smov 0  }
   0x6 LB: > { %s1918_s19 = sadd.s32 4294967295, %s2442_s18   ;;  %s1919_s20 = sadd.s32 4294967294, %s2442_s18   ;;  %s2442_s18 = sphi %s2512_s18, %s23_s18   ;;  %s2438_s17 = sphi %s2510_s17, %s2913_s17   ;;  %s2434_s16 = sphi %s2508_s16, %s2912_s16   ;;  %s2430_s15 = sphi %s2506_s15, %s2911_s15   ;;  %s2426_s14 = sphi %s2504_s14, %s2910_s14   ;;  %s2422_s13 = sphi %s2502_s13, %s2909_s13  }
   0x7   : > { %s35_s21 = sadd.s32 1, %s2438_s17  ;;  %s266_s22 = sadd.s32 1, %s2430_s15 }
   0x8   : > { %p37_p0 = scmp.ge.s32.totalorder %s35_s21, 2  ;;  %p276_p1 = scmp.ne.s32.totalorder %s2430_s15, %s2426_s14 }
   0x9   : > { %p277_p2 = scmp.eq.s32.totalorder %s1918_s19, 1  ;;  %p282_p3 = scmp.ne.s32.totalorder %s2426_s14, %s2422_s13 }
   0xa   : > { %s2915_s21 = smov (%p37_p0, %s35_s21), 0  ;;  %p283_p5 = scmp.eq.s32.totalorder %s1919_s20, 1 }
   0xb   : > { %p2542_p4 = por %p277_p2, %p276_p1  ;;  %s261_s24 = ssub.s32 %s2438_s17, %s2915_s21 }
   0xc   : > { %p1922_p6 = scmp.ge.s32.totalorder %s2442_s18, 1  ;;  %p264_p7 = scmp.eq.s32.totalorder %s261_s24, 0 }
   0xd   : > { %p2549_p8 = por %p283_p5, %p282_p3  ;;  %p342_p9 = scmp.lt.s32.totalorder %s2442_s18, 3 }
   0xe   : > { %s2555_s26 = scalar_select %p264_p7, %s2430_s15, %s266_s22  }
   0xf   : > { %p343_p10 = pnand %p1922_p6, %p342_p9 }
  0x10   : > { %v2324_v0 = vld [vmem:[%s2898_s4] sm:$0xff] (!%p343_p10)   ;;  %v2444_v1 = vmov (!%p343_p10), 0.0   ;;  %v2325_v2 = vld [vmem:[%s2898_s4 + $0x8] sm:$0xff] (!%p343_p10)   ;;  %vm2445_vm0 = vmmov (!%p343_p10), 0   ;;  %p386_p11 = scmp.lt.s32.totalorder (!%p343_p10), %s2434_s16, 1  ;;  %s2908_s0 = sld [smem:[#allocation5_spill]] (!%p343_p10) }
  0x11   : > { %346 = sbr.rel (%p343_p10) target bundleno = 3927 (0xf57), region = 60  ;;  %2107 = vmatprep.subr.bf16.mxu1 (!%p343_p10), %v2444_v1  ;;  %2099 = vmatprep.subr.bf16.mxu0 (!%p343_p10), %v2444_v1  ;;  %v2326_v3 = vld [vmem:[%s2896_s2] sm:$0xff] (!%p343_p10)   ;;  %v2327_v4 = vld [vmem:[%s2896_s2 + $0x8] sm:$0xff] (!%p343_p10)   ;;  %vm425_vm1 = vcmask (!%p343_p10), 261120   ;;  %vm600_vm2 = vcmask (!%p343_p10), 64512   ;;  %vm663_vm3 = vcmask (!%p343_p10), 1043456  }
  0x12   : > { %2108 = vmatpush3.bf16.msra.mxu1 (!%p343_p10), %v2324_v0  ;;  %2111 = vmatprep.mubr.msk.bf16.mxu1 (!%p343_p10), %vm2445_vm0, %v2444_v1  ;;  %v1930_v9 = vld [vmem:[%s2899_s5] ss:$0 sm:$0xff] (!%p343_p10)  ;;  %v2329_v25 = vld [vmem:[%s2900_s6 + $0x8] sm:$0xff] (!%p343_p10)   ;;  %v2332_v44 = vld [vmem:[%s2896_s2 + $0x10] sm:$0xff] (!%p343_p10)   ;;  %s383_s22 = sand.u32 (!%p343_p10), 1, %s2426_s14   ;;  %vm1818_vm4 = vcmask (!%p343_p10), 130048  }
  0x13   : > { %2109 = vmatprep.subr.bf16.mxu1 (!%p343_p10), %v2444_v1  ;;  %2103 = vmatprep.mubr.msk.bf16.mxu0 (!%p343_p10), %vm2445_vm0, %v2444_v1  ;;  %v1926_v16 = vld [vmem:[%s2897_s3] ss:$0 sm:$0xff] (!%p343_p10)  ;;  %v2333_v45 = vld [vmem:[%s2896_s2 + $0x18] sm:$0xff] (!%p343_p10)   ;;  %v2330_v49 = vld [vmem:[%s2898_s4 + $0x10] sm:$0xff] (!%p343_p10)   ;;  %s2446_s27 = smov (!%p343_p10), [#allocation2]  }
  0x14   : > { %2100 = vmatpush3.bf16.msra.mxu0 (!%p343_p10), %v2326_v3  ;;  %v2328_v24 = vld [vmem:[%s2900_s6] sm:$0xff] (!%p343_p10)   ;;  %v2331_v51 = vld [vmem:[%s2898_s4 + $0x18] sm:$0xff] (!%p343_p10)   ;;  %s2368_s28 = sshll.u32 (!%p343_p10), %s2446_s27, 4  ;;  %s2369_s28 = int_to_ptr.vmem [resolvable:$false] %s2368_s28 }
  0x15   : > { %2101 = vmatprep.subr.bf16.mxu0 (!%p343_p10), %v2444_v1  ;;  %v1934_v39 = vld [vmem:[%s2901_s7] ss:$0 sm:$0xff] (!%p343_p10)  ;;  %v1954_v60 = vld [vmem:[%s2899_s5 + $0x1] ss:$0 sm:$0xff] (!%p343_p10) }
  0x16   : > { %2110 = vmatpush3.bf16.msra.mxu1 (!%p343_p10), %v2325_v2  ;;  %v1945_v2 = vld [vmem:[%s2897_s3 + $0x1] ss:$0 sm:$0xff] (!%p343_p10) }
  0x17   : > { %2123 = vmatprep.subr.bf16.mxu1 (!%p343_p10), %v2444_v1 }
  0x18   : > { %s387_s19 = scalar_select %p386_p11, %s2434_s16, 1  ;;  %2102 = vmatpush3.bf16.msra.mxu0 %v2327_v4 }
  0x19   : > { %2115 = vmatprep.subr.bf16.mxu0 %v2444_v1 }
  0x1a   : > { %s1924_s24 = sshll.u32 %s387_s19, 3 }
  0x1b   : > { %s396_s29 = scalar_lea.vmem %s2895_s1, %s1924_s24  ;;  %s392_s12 = scalar_lea.vmem %s2908_s0, %s1924_s24 }
  0x1c   : > { %v400_v5 = vld [vmem:[%s396_s29] sm:$0xff]  ;;  %s1923_s24 = sshll.u32 %s383_s22, 3  ;;  %s2036_s29 = sshll.u32 %s2434_s16, 7 }
  0x1d   : > { %v398_v6 = vld [vmem:[%s392_s12] sm:$0xff]  ;;  %v2586_v7 = vpack.c.bf16 %v400_v5, %v400_v5  ;;  %s385_s30 = scalar_lea.vmem [#allocation2], %s1923_s24  ;;  %s2847_s20 = scalar_lea.hbm %s2904_s10, %s2036_s29 }
  0x1e   : > { %v2588_v8 = vpack.c.bf16 %v398_v6, %v398_v6  ;;  %s1835_s11 = sshll.u32 %s385_s30, 4  ;;  %s1821_s16 = scalar_lea.sflag [#allocation3], %s383_s22  ;;  %s2849_s11 = int_to_ptr.vmem [resolvable:$true] %s1835_s11 }
  0x1f   : > { %2112 = vmatmul.mubr.msk.bf16.vlgmr.msra.gmra.mrb[0].mxu1 %vm425_vm1, %v2586_v7  ;;  %s2364_s24 = scalar_lea.vmem %s2849_s11, 128  ;;  %s2370_s0 = scalar_lea.vmem %s2369_s28, 256 }
  0x20   : > { %2104 = vmatmul.mubr.msk.bf16.vlgmr.msra.gmra.mrb[0].mxu0 %vm425_vm1, %v2588_v8  ;;  %2125 = vmatprep.mubr.msk.bf16.mxu1 %vm2445_vm0, %v2444_v1  ;;  %p2365_p12 = scmp.ne.s32.totalorder %s2849_s11, %s2364_s24  ;;  %p2371_p1 = scmp.lt.s32.totalorder %s2849_s11, %s2369_s28 }
  0x21   : > { %2119 = vmatprep.mubr.msk.bf16.mxu0 %vm2445_vm0, %v2444_v1  ;;  %2116 = vmatpush3.bf16.msra.mxu0 %v2328_v24  ;;  %p2372_p2 = scmp.lt.s32.totalorder %s2370_s0, %s2364_s24 }
  0x22   : > { %2117 = vmatprep.subr.bf16.mxu0 %v2444_v1  ;;  %p2366_p13 = pnand %p2365_p12, %p2542_p4 }
  0x23   : > { %p2373_p3 = por %p2372_p2, %p2371_p1 }
  0x24   : > { %p2367_p0 = pneg %p2366_p13 }
  0x25   : > { %2118 = vmatpush3.bf16.msra.mxu0 %v2329_v25 }
  0x26   : > { %2129 = vmatprep.subr.bf16.mxu0 %v2444_v1  ;;  %p2374_p5 = pnand %p2373_p3, %p2367_p0 }
  0x28   : > { %2120 = vmatmul.mubr.msk.bf16.vlgmr.msra.gmra.mrb[4].mxu0 %vm425_vm1, %v2586_v7 }
  0x29   : > { %2131 = vmatprep.mubr.msk.bf16.mxu0 %vm2445_vm0, %v2444_v1 }
  0xf2   : > { %v529_v10 = vpop.f32.mrb[0].mxu1 }
  0xf3   : > { %v463_v11 = vpop.f32.mrb[0].mxu0  ;;  %v530_v12 = vadd.f32 %v1930_v9, %v529_v10  ;;  %v2113_v13 = vpop.f32.mrb[1].mxu1  ;;  %v2334_v10 = vld [vmem:[%s2900_s6 + $0x10] sm:$0xff]  }
  0xf4   : > { %v2105_v14 = vpop.f32.mrb[1].mxu0  ;;  %v532_v15 = vpop.f32.mrb[2].mxu1  ;;  %v464_v22 = vadd.f32 %v1926_v16, %v463_v11  ;;  %v2335_v11 = vld [vmem:[%s2900_s6 + $0x18] sm:$0xff]  }
  0xf5   : > { %v466_v17 = vpop.f32.mrb[2].mxu0  ;;  %v599_v18 = vpack.c.bf16 %v530_v12, %v530_v12  ;;  %v2114_v19 = vpop.f32.mrb[3].mxu1 }
  0xf6   : > { %v2106_v20 = vpop.f32.mrb[3].mxu0  ;;  %v598_v23 = vpack.c.bf16 %v464_v22, %v464_v22  ;;  %v1963_v17 = vld [vmem:[%s2901_s7 + $0x1] ss:$0 sm:$0xff] }
  0xf7   : > { %v605_v21 = vsel %vm600_vm2, %v599_v18, 0 }
  0xf8   : > { %2124 = vmatpush3.bf16.xpose.msra.mxu1 %v605_v21 }
  0xf9   : > { %2135 = vmatprep.subr.bf16.mxu1 %v2444_v1 }
  0xfb   : > { %v592_v36 = vpop.f32.mrb[4].mxu0 }
  0xfc   : > { %v2121_v37 = vpop.f32.mrb[5].mxu0  ;;  %v593_v41 = vadd.f32 %v1934_v39, %v592_v36 }
  0xfd   : > { %v595_v38 = vpop.f32.mrb[6].mxu0 }
  0xfe   : > { %v2122_v40 = vpop.f32.mrb[7].mxu0  ;;  %v659_v42 = vpack.c.bf16 %v593_v41, %v593_v41  ;;  %v2336_v38 = vld [vmem:[%s2898_s4 + $0x20] sm:$0xff]  }
  0xff   : > { %2126 = vmatmul.mubr.msk.bf16.vlgmr.msra.gmra.mrb[4].mxu1 %vm600_vm2, %v598_v23  ;;  %v2337_v40 = vld [vmem:[%s2898_s4 + $0x28] sm:$0xff]  }
 0x100   : > { %2139 = vmatprep.mubr.msk.bf16.mxu1 %vm2445_vm0, %v2444_v1  ;;  %v665_v43 = vsel %vm663_vm3, %v659_v42, 0  ;;  %2136 = vmatpush3.bf16.msra.mxu1 %v2332_v44  ;;  %v2338_v42 = vld [vmem:[%s2896_s2 + $0x20] sm:$0xff]  }
 0x101   : > { %2130 = vmatpush3.bf16.msra.mxu0 %v665_v43  ;;  %2137 = vmatprep.subr.bf16.mxu1 %v2444_v1 }
 0x102   : > { %2143 = vmatprep.subr.bf16.mxu0 %v2444_v1 }
 0x104   : > { %2138 = vmatpush3.bf16.msra.mxu1 %v2333_v45 }
 0x105   : > { %2151 = vmatprep.subr.bf16.mxu1 %v2444_v1 }
 0x107   : > { %2140 = vmatmul.mubr.msk.bf16.vlgmr.msra.gmra.mrb[8].mxu1 %vm425_vm1, %v2588_v8 }
 0x108   : > { %2155 = vmatprep.mubr.msk.bf16.mxu1 %vm2445_vm0, %v2444_v1  ;;  %2152 = vmatpush3.bf16.msra.mxu1 %v2334_v10 }
 0x109   : > { %2153 = vmatprep.subr.bf16.mxu1 %v2444_v1 }
 0x10c   : > { %2154 = vmatpush3.bf16.msra.mxu1 %v2335_v11  ;;  %v2340_v11 = vld [vmem:[%s2900_s6 + $0x20] sm:$0xff]  }
 0x10d   : > { %2165 = vmatprep.subr.bf16.mxu1 %v2444_v1 }
 0x10f   : > { %2156 = vmatmul.mubr.msk.bf16.vlgmr.msra.gmra.mrb[12].mxu1 %vm425_vm1, %v2586_v7 }
 0x110   : > { %2167 = vmatprep.mubr.msk.bf16.mxu1 %vm2445_vm0, %v2444_v1 }
 0x1d2   : > { %v641_v26 = vpop.f32.mrb[4].mxu1 }
 0x1d3   : > { %v2127_v27 = vpop.f32.mrb[5].mxu1  ;;  %v647_v28 = vsel %vm600_vm2, %v641_v26, -inf }
 0x1d4   : > { %648 = vmax.xlane.f32.xlu0 %v647_v28  ;;  %v644_v29 = vpop.f32.mrb[6].mxu1 }
 0x1d5   : > { %v2128_v30 = vpop.f32.mrb[7].mxu1 }
 0x1d6   : > { %v1969_v30 = vld [vmem:[%s2902_s8 + $0x4] sm:$0xf] }
 0x1da   : > { %v768_v52 = vpop.f32.mrb[8].mxu1 }
 0x1db   : > { %v2141_v53 = vpop.f32.mrb[9].mxu1  ;;  %v769_v6 = vadd.f32 %v1945_v2, %v768_v52  ;;  %v1986_v52 = vld [vmem:[%s2899_s5 + $0x2] ss:$0 sm:$0xff] }
 0x1dc   : > { %v771_v54 = vpop.f32.mrb[10].mxu1  ;;  %v1977_v2 = vld [vmem:[%s2897_s3 + $0x2] ss:$0 sm:$0xff] }
 0x1dd   : > { %v2142_v55 = vpop.f32.mrb[11].mxu1  ;;  %v904_v9 = vpack.c.bf16 %v769_v6, %v769_v6 }
 0x1e2   : > { %v898_v18 = vpop.f32.mrb[12].mxu1 }
 0x1e3   : > { %v899_v19 = vadd.f32 %v1963_v17, %v898_v18  ;;  %v2157_v20 = vpop.f32.mrb[13].mxu1 }
 0x1e4   : > { %v901_v21 = vpop.f32.mrb[14].mxu1 }
 0x1e5   : > { %v964_v22 = vpack.c.bf16 %v899_v19, %v899_v19  ;;  %v2158_v23 = vpop.f32.mrb[15].mxu1 }
 0x1e7   : > { %v969_v24 = vsel %vm663_vm3, %v964_v22, 0 }
 0x1e8   : > { %2166 = vmatpush3.bf16.msra.mxu1 %v969_v24 }
 0x1e9   : > { %2177 = vmatprep.subr.bf16.mxu1 %v2444_v1 }
 0x261   : > { %v649_v31 = vpop.xlane.xlu0 %648 }
 0x262   : > { %v650_v32 = vsub.f32 %v641_v26, %v649_v31  ;;  %v1018_v31 = vsel %vm663_vm3, %v1969_v30, 0 }
 0x264   : > { %v651_v33 = vmul.f32 1.442695, %v650_v32 }
 0x266   : > { %2348 = vpow2.f32 %v651_v33 }
 0x270   : > { %v2349_v34 = vpop.eup %2348 }
 0x271   : > { %v653_v35 = vsel %vm600_vm2, %v2349_v34, 0.0 }
 0x272   : > { %654 = vadd.xlane.f32.xlu0 %v653_v35 }
 0x2ff   : > { %v655_v46 = vpop.xlane.xlu0 %654 }
 0x300   : > { %2350 = vrcp.f32 %v655_v46 }
 0x30a   : > { %v2351_v47 = vpop.eup %2350 }
 0x30b   : > { %v657_v48 = vmul.f32 %v2351_v47, %v2349_v34  ;;  %v708_v34 = vld [vmem:[%s2902_s8] sm:$0xf]  ;;  %v2339_v47 = vld [vmem:[%s2896_s2 + $0x28] sm:$0xff]  }
 0x30c   : > { %v1064_v37 = vsel %vm663_vm3, %v708_v34, 0 }
 0x30d   : > { %v658_v50 = vpack.c.bf16 %v657_v48, %v657_v48 }
 0x30f   : > { %2132 = vmatmul.mubr.msk.bf16.vlgmr.msra.gmra.mrb[8].mxu0 %vm600_vm2, %v658_v50 }
 0x310   : > { %2144 = vmatpush3.bf16.msra.mxu0 %v2330_v49  ;;  %2147 = vmatprep.mubr.msk.bf16.mxu0 %vm2445_vm0, %v2444_v1 }
 0x311   : > { %2145 = vmatprep.subr.bf16.mxu0 %v2444_v1 }
 0x314   : > { %2146 = vmatpush3.bf16.msra.mxu0 %v2331_v51 }
 0x315   : > { %2159 = vmatprep.subr.bf16.mxu0 %v2444_v1 }
 0x317   : > { %2148 = vmatmul.mubr.msk.bf16.vlgmr.msra.gmra.mrb[12].mxu0 %vm425_vm1, %v2586_v7 }
 0x318   : > { %2161 = vmatprep.mubr.msk.bf16.mxu0 %vm2445_vm0, %v2444_v1 }
 0x3e2   : > { %v2656_v56 = vpop.f32.mrb[8].mxu0 }
 0x3e3   : > { %v2133_v57 = vpop.f32.mrb[9].mxu0  ;;  %v707_v39 = vpack.c.bf16 %v2656_v56, %v2656_v56 }
 0x3e4   : > { %v704_v58 = vpop.f32.mrb[10].mxu0 }
 0x3e5   : > { %v2134_v59 = vpop.f32.mrb[11].mxu0 }
 0x3ea   : > { %v833_v61 = vpop.f32.mrb[12].mxu0 }
 0x3eb   : > { %v834_v62 = vadd.f32 %v1954_v60, %v833_v61  ;;  %v2149_v63 = vpop.f32.mrb[13].mxu0 }
 0x3ec   : > { %v836_v0 = vpop.f32.mrb[14].mxu0 }
 0x3ed   : > { %v905_v3 = vpack.c.bf16 %v834_v62, %v834_v62  ;;  %v2150_v4 = vpop.f32.mrb[15].mxu0 }
 0x3ef   : > { %v910_v5 = vsel %vm600_vm2, %v905_v3, 0 }
 0x3f0   : > { %2160 = vmatpush3.bf16.xpose.msra.mxu0 %v910_v5 }
 0x3f1   : > { %2171 = vmatprep.subr.bf16.mxu0 %v2444_v1 }
 0x3f7   : > { %2162 = vmatmul.mubr.msk.bf16.vlgmr.msra.gmra.mrb[16].mxu0 %vm600_vm2, %v904_v9 }
 0x3f8   : > { %2173 = vmatprep.mubr.msk.bf16.mxu0 %vm2445_vm0, %v2444_v1  ;;  %2172 = vmatpush3.bf16.msra.mxu0 %v1018_v31  ;;  %v2001_v31 = vld [vmem:[%s2902_s8 + $0x8] sm:$0xf] }
 0x3f9   : > { %2183 = vmatprep.subr.bf16.mxu0 %v2444_v1 }
 0x4ca   : > { %v946_v12 = vpop.f32.mrb[16].mxu0 }
 0x4cb   : > { %v2163_v13 = vpop.f32.mrb[17].mxu0  ;;  %v952_v14 = vsel %vm600_vm2, %v946_v12, -inf }
 0x4cc   : > { %953 = vmax.xlane.f32.xlu1 %v952_v14  ;;  %v949_v15 = vpop.f32.mrb[18].mxu0 }
 0x4cd   : > { %v2164_v16 = vpop.f32.mrb[19].mxu0 }
 0x559   : > { %v954_v25 = vpop.xlane.xlu1 %953 }
 0x55a   : > { %v955_v26 = vsub.f32 %v946_v12, %v954_v25  ;;  %v2341_v12 = vld [vmem:[%s2900_s6 + $0x28] sm:$0xff]  }
 0x55c   : > { %v956_v27 = vmul.f32 1.442695, %v955_v26  ;;  %v1995_v26 = vld [vmem:[%s2901_s7 + $0x2] ss:$0 sm:$0xff] }
 0x55e   : > { %2352 = vpow2.f32 %v956_v27 }
 0x568   : > { %v2353_v28 = vpop.eup %2352 }
 0x569   : > { %v958_v29 = vsel %vm600_vm2, %v2353_v28, 0.0 }
 0x56a   : > { %959 = vadd.xlane.f32.xlu1 %v958_v29 }
 0x5f7   : > { %v960_v32 = vpop.xlane.xlu1 %959 }
 0x5f8   : > { %2354 = vrcp.f32 %v960_v32  ;;  %v1415_v32 = vsel %vm663_vm3, %v2001_v31, 0 }
 0x602   : > { %v2355_v33 = vpop.eup %2354 }
 0x603   : > { %v962_v35 = vmul.f32 %v2355_v33, %v2353_v28 }
 0x605   : > { %v963_v36 = vpack.c.bf16 %v962_v35, %v962_v35 }
 0x607   : > { %2168 = vmatmul.mubr.msk.bf16.vlgmr.msra.gmra.mrb[16].mxu1 %vm600_vm2, %v963_v36 }
 0x608   : > { %2178 = vmatpush3.bf16.msra.mxu1 %v1064_v37  ;;  %2179 = vmatprep.mubr.msk.bf16.mxu1 %vm2445_vm0, %v2444_v1  ;;  %v2344_v37 = vld [vmem:[%s2896_s2 + $0x30] sm:$0xff]  }
 0x609   : > { %2191 = vmatprep.subr.bf16.mxu1 %v2444_v1 }
 0x60f   : > { %2180 = vmatmul.mubr.msk.bf16.vlgmr.msra.gmra.mrb[20].mxu1 %vm600_vm2, %v707_v39 }
 0x610   : > { %2192 = vmatpush3.bf16.msra.mxu1 %v2336_v38  ;;  %2195 = vmatprep.mubr.msk.bf16.mxu1 %vm2445_vm0, %v2444_v1  ;;  %v2345_v38 = vld [vmem:[%s2896_s2 + $0x38] sm:$0xff]  }
 0x611   : > { %2193 = vmatprep.subr.bf16.mxu1 %v2444_v1 }
 0x614   : > { %2194 = vmatpush3.bf16.msra.mxu1 %v2337_v40  ;;  %v2342_v40 = vld [vmem:[%s2898_s4 + $0x30] sm:$0xff]  }
 0x615   : > { %2207 = vmatprep.subr.bf16.mxu1 %v2444_v1 }
 0x617   : > { %2196 = vmatmul.mubr.msk.bf16.vlgmr.msra.gmra.mrb[24].mxu1 %vm425_vm1, %v2586_v7 }
 0x618   : > { %2209 = vmatprep.mubr.msk.bf16.mxu1 %vm2445_vm0, %v2444_v1 }
 0x6da   : > { %v1005_v41 = vpop.f32.mrb[16].mxu1 }
 0x6db   : > { %v1011_v43 = vpack.c.bf16 %v1005_v41, %v1005_v41  ;;  %v2169_v44 = vpop.f32.mrb[17].mxu1 }
 0x6dc   : > { %v1008_v45 = vpop.f32.mrb[18].mxu1 }
 0x6dd   : > { %v2170_v46 = vpop.f32.mrb[19].mxu1  ;;  %2174 = vmatmul.mubr.msk.bf16.vlgmr.msra.gmra.mrb[20].mxu0 %vm600_vm2, %v1011_v43  ;;  %v2343_v45 = vld [vmem:[%s2898_s4 + $0x38] sm:$0xff]  }
 0x6de   : > { %2184 = vmatpush3.bf16.msra.mxu0 %v2338_v42  ;;  %2187 = vmatprep.mubr.msk.bf16.mxu0 %vm2445_vm0, %v2444_v1 }
 0x6df   : > { %2185 = vmatprep.subr.bf16.mxu0 %v2444_v1 }
 0x6e2   : > { %v1100_v48 = vpop.f32.mrb[20].mxu1  ;;  %2186 = vmatpush3.bf16.msra.mxu0 %v2339_v47 }
 0x6e3   : > { %v2181_v49 = vpop.f32.mrb[21].mxu1  ;;  %2199 = vmatprep.subr.bf16.mxu0 %v2444_v1 }
 0x6e4   : > { %v1103_v50 = vpop.f32.mrb[22].mxu1 }
 0x6e5   : > { %v2182_v51 = vpop.f32.mrb[23].mxu1  ;;  %2188 = vmatmul.mubr.msk.bf16.vlgmr.msra.gmra.mrb[24].mxu0 %vm425_vm1, %v2588_v8 }
 0x6e6   : > { %2203 = vmatprep.mubr.msk.bf16.mxu0 %vm2445_vm0, %v2444_v1  ;;  %2200 = vmatpush3.bf16.msra.mxu0 %v2340_v11 }
 0x6e7   : > { %2201 = vmatprep.subr.bf16.mxu0 %v2444_v1 }
 0x6ea   : > { %v1230_v53 = vpop.f32.mrb[24].mxu1  ;;  %2202 = vmatpush3.bf16.msra.mxu0 %v2341_v12 }
 0x6eb   : > { %v1231_v54 = vadd.f32 %v1986_v52, %v1230_v53  ;;  %v2197_v55 = vpop.f32.mrb[25].mxu1  ;;  %2213 = vmatprep.subr.bf16.mxu0 %v2444_v1 }
 0x6ec   : > { %v1233_v56 = vpop.f32.mrb[26].mxu1 }
 0x6ed   : > { %v1302_v57 = vpack.c.bf16 %v1231_v54, %v1231_v54  ;;  %v2198_v58 = vpop.f32.mrb[27].mxu1  ;;  %2204 = vmatmul.mubr.msk.bf16.vlgmr.msra.gmra.mrb[28].mxu0 %vm425_vm1, %v2586_v7  ;;  %v2017_v54 = vld [vmem:[%s2899_s5 + $0x3] ss:$0 sm:$0xff] }
 0x6ee   : > { %2215 = vmatprep.mubr.msk.bf16.mxu0 %vm2445_vm0, %v2444_v1 }
 0x6ef   : > { %v1307_v59 = vsel %vm600_vm2, %v1302_v57, 0 }
 0x6f0   : > { %2208 = vmatpush3.bf16.xpose.msra.mxu1 %v1307_v59  ;;  %v2008_v59 = vld [vmem:[%s2897_s3 + $0x3] ss:$0 sm:$0xff] }
 0x6f1   : > { %2219 = vmatprep.subr.bf16.mxu1 %v2444_v1 }
 0x7b0   : > { %v1054_v60 = vpop.f32.mrb[20].mxu0 }
 0x7b1   : > { %v2738_v61 = vadd.f32 %v1100_v48, %v1054_v60  ;;  %v2175_v62 = vpop.f32.mrb[21].mxu0 }
 0x7b2   : > { %v1057_v63 = vpop.f32.mrb[22].mxu0 }
 0x7b3   : > { %v2176_v0 = vpop.f32.mrb[23].mxu0 }
 0x7b8   : > { %v1165_v3 = vpop.f32.mrb[24].mxu0 }
 0x7b9   : > { %v1166_v4 = vadd.f32 %v1977_v2, %v1165_v3  ;;  %v2189_v5 = vpop.f32.mrb[25].mxu0  ;;  %v2346_v2 = vld [vmem:[%s2900_s6 + $0x30] sm:$0xff]   ;;  %v2347_v3 = vld [vmem:[%s2900_s6 + $0x38] sm:$0xff]  }
 0x7ba   : > { %v1168_v6 = vpop.f32.mrb[26].mxu0 }
 0x7bb   : > { %v1301_v9 = vpack.c.bf16 %v1166_v4, %v1166_v4  ;;  %v2190_v10 = vpop.f32.mrb[27].mxu0 }
 0x7bd   : > { %2210 = vmatmul.mubr.msk.bf16.vlgmr.msra.gmra.mrb[28].mxu1 %vm600_vm2, %v1301_v9 }
 0x7be   : > { %2221 = vmatprep.mubr.msk.bf16.mxu1 %vm2445_vm0, %v2444_v1  ;;  %2220 = vmatpush3.bf16.msra.mxu1 %v1415_v32 }
 0x7bf   : > { %2233 = vmatprep.subr.bf16.mxu1 %v2444_v1 }
 0x7c0   : > { %v1295_v23 = vpop.f32.mrb[28].mxu0 }
 0x7c1   : > { %v2205_v24 = vpop.f32.mrb[29].mxu0  ;;  %v1296_v28 = vadd.f32 %v1995_v26, %v1295_v23 }
 0x7c2   : > { %v1298_v25 = vpop.f32.mrb[30].mxu0 }
 0x7c3   : > { %v2206_v27 = vpop.f32.mrb[31].mxu0  ;;  %v1361_v29 = vpack.c.bf16 %v1296_v28, %v1296_v28 }
 0x7c5   : > { %v1366_v30 = vsel %vm663_vm3, %v1361_v29, 0 }
 0x7c6   : > { %2214 = vmatpush3.bf16.msra.mxu0 %v1366_v30 }
 0x7c7   : > { %2225 = vmatprep.subr.bf16.mxu0 %v2444_v1 }
 0x890   : > { %v1343_v13 = vpop.f32.mrb[28].mxu1 }
 0x891   : > { %v2211_v14 = vpop.f32.mrb[29].mxu1  ;;  %v1349_v15 = vsel %vm600_vm2, %v1343_v13, -inf }
 0x892   : > { %1350 = vmax.xlane.f32.xlu0 %v1349_v15  ;;  %v1346_v16 = vpop.f32.mrb[30].mxu1 }
 0x893   : > { %v2212_v17 = vpop.f32.mrb[31].mxu1 }
 0x91f   : > { %v1351_v18 = vpop.xlane.xlu0 %1350 }
 0x920   : > { %v1352_v19 = vsub.f32 %v1343_v13, %v1351_v18 }
 0x922   : > { %v1353_v20 = vmul.f32 1.442695, %v1352_v19 }
 0x924   : > { %2356 = vpow2.f32 %v1353_v20 }
 0x92e   : > { %v2357_v21 = vpop.eup %2356 }
 0x92f   : > { %v1355_v22 = vsel %vm600_vm2, %v2357_v21, 0.0 }
 0x930   : > { %1356 = vadd.xlane.f32.xlu1 %v1355_v22  ;;  %v2032_v22 = vld [vmem:[%s2902_s8 + $0xc] sm:$0xf] }
 0x931   : > { %v1767_v23 = vsel %vm663_vm3, %v2032_v22, 0 }
 0x9bd   : > { %v1357_v33 = vpop.xlane.xlu1 %1356 }
 0x9be   : > { %2358 = vrcp.f32 %v1357_v33 }
 0x9c8   : > { %v2359_v34 = vpop.eup %2358 }
 0x9c9   : > { %v1359_v35 = vmul.f32 %v2359_v34, %v2357_v21  ;;  %v2034_v34 = vld [vmem:[%s2903_s9] ss:$0 sm:$0xff] }
 0x9cb   : > { %v1360_v36 = vpack.c.bf16 %v1359_v35, %v1359_v35 }
 0x9cd   : > { %2216 = vmatmul.mubr.msk.bf16.vlgmr.msra.gmra.mrb[32].mxu0 %vm600_vm2, %v1360_v36 }
 0x9ce   : > { %2229 = vmatprep.mubr.msk.bf16.mxu0 %vm2445_vm0, %v2444_v1  ;;  %2226 = vmatpush3.bf16.msra.mxu0 %v2344_v37 }
 0x9cf   : > { %2227 = vmatprep.subr.bf16.mxu0 %v2444_v1 }
 0x9d2   : > { %2228 = vmatpush3.bf16.msra.mxu0 %v2345_v38 }
 0x9d3   : > { %2241 = vmatprep.subr.bf16.mxu0 %v2444_v1 }
 0x9d5   : > { %2230 = vmatmul.mubr.msk.bf16.vlgmr.msra.gmra.mrb[36].mxu0 %vm425_vm1, %v2588_v8 }
 0x9d6   : > { %2245 = vmatprep.mubr.msk.bf16.mxu0 %vm2445_vm0, %v2444_v1  ;;  %2242 = vmatpush3.bf16.msra.mxu0 %v2346_v2 }
 0x9d7   : > { %2243 = vmatprep.subr.bf16.mxu0 %v2444_v1 }
 0x9da   : > { %2244 = vmatpush3.bf16.msra.mxu0 %v2347_v3 }
 0x9db   : > { %2255 = vmatprep.subr.bf16.mxu0 %v2444_v1 }
 0x9dd   : > { %2246 = vmatmul.mubr.msk.bf16.vlgmr.msra.gmra.mrb[40].mxu0 %vm425_vm1, %v2586_v7 }
 0x9de   : > { %2257 = vmatprep.mubr.msk.bf16.mxu0 %vm2445_vm0, %v2444_v1 }
 0xaa0   : > { %v1402_v39 = vpop.f32.mrb[32].mxu0 }
 0xaa1   : > { %v1408_v41 = vpack.c.bf16 %v1402_v39, %v1402_v39  ;;  %v2217_v42 = vpop.f32.mrb[33].mxu0 }
 0xaa2   : > { %v1405_v43 = vpop.f32.mrb[34].mxu0 }
 0xaa3   : > { %v2218_v44 = vpop.f32.mrb[35].mxu0  ;;  %2222 = vmatmul.mubr.msk.bf16.vlgmr.msra.gmra.mrb[32].mxu1 %vm600_vm2, %v1408_v41 }
 0xaa4   : > { %2234 = vmatpush3.bf16.msra.mxu1 %v2342_v40  ;;  %2237 = vmatprep.mubr.msk.bf16.mxu1 %vm2445_vm0, %v2444_v1 }
 0xaa5   : > { %2235 = vmatprep.subr.bf16.mxu1 %v2444_v1 }
 0xaa8   : > { %2236 = vmatpush3.bf16.msra.mxu1 %v2343_v45  ;;  %v1517_v8 = vpop.f32.mrb[36].mxu0 }
 0xaa9   : > { %2249 = vmatprep.subr.bf16.mxu1 %v2444_v1  ;;  %v2231_v46 = vpop.f32.mrb[37].mxu0  ;;  %v1518_v63 = vadd.f32 %v2008_v59, %v1517_v8 }
 0xaaa   : > { %v1520_v47 = vpop.f32.mrb[38].mxu0 }
 0xaab   : > { %2238 = vmatmul.mubr.msk.bf16.vlgmr.msra.gmra.mrb[36].mxu1 %vm425_vm1, %v2586_v7  ;;  %v2232_v48 = vpop.f32.mrb[39].mxu0  ;;  %v1653_v0 = vpack.c.bf16 %v1518_v63, %v1518_v63 }
 0xaac   : > { %2251 = vmatprep.mubr.msk.bf16.mxu1 %vm2445_vm0, %v2444_v1 }
 0xab0   : > { %v1647_v16 = vpop.f32.mrb[40].mxu0 }
 0xab1   : > { %v2247_v7 = vpop.f32.mrb[41].mxu0 }
 0xab2   : > { %v1650_v17 = vpop.f32.mrb[42].mxu0 }
 0xab3   : > { %v2248_v18 = vpop.f32.mrb[43].mxu0 }
 0xb76   : > { %v1451_v49 = vpop.f32.mrb[32].mxu1 }
 0xb77   : > { %v2801_v50 = vadd.f32 %v1451_v49, %v2738_v61  ;;  %v2223_v51 = vpop.f32.mrb[33].mxu1 }
 0xb78   : > { %v1454_v52 = vpop.f32.mrb[34].mxu1 }
 0xb79   : > { %v2224_v53 = vpop.f32.mrb[35].mxu1 }
 0xb7e   : > { %v1582_v55 = vpop.f32.mrb[36].mxu1 }
 0xb7f   : > { %v1583_v56 = vadd.f32 %v2017_v54, %v1582_v55  ;;  %v2239_v57 = vpop.f32.mrb[37].mxu1 }
 0xb80   : > { %v1585_v58 = vpop.f32.mrb[38].mxu1 }
 0xb81   : > { %v1654_v60 = vpack.c.bf16 %v1583_v56, %v1583_v56  ;;  %v2240_v62 = vpop.f32.mrb[39].mxu1 }
 0xb83   : > { %v1659_v61 = vsel %vm600_vm2, %v1654_v60, 0 }
 0xb84   : > { %2250 = vmatpush3.bf16.xpose.msra.mxu1 %v1659_v61 }
 0xb85   : > { %2261 = vmatprep.subr.bf16.mxu1 %v2444_v1 }
 0xb8b   : > { %2252 = vmatmul.mubr.msk.bf16.vlgmr.msra.gmra.mrb[40].mxu1 %vm600_vm2, %v1653_v0 }
 0xb8c   : > { %2263 = vmatprep.mubr.msk.bf16.mxu1 %vm2445_vm0, %v2444_v1  ;;  %v2026_v1 = vld [vmem:[%s2901_s7 + $0x3] ss:$0 sm:$0xff]  ;;  %2262 = vmatpush3.bf16.msra.mxu1 %v1767_v23 }
 0xb8d   : > { %v1648_v19 = vadd.f32 %v2026_v1, %v1647_v16 }
 0xb8f   : > { %v1713_v20 = vpack.c.bf16 %v1648_v19, %v1648_v19 }
 0xb91   : > { %v1718_v21 = vsel %vm663_vm3, %v1713_v20, 0 }
 0xb92   : > { %2256 = vmatpush3.bf16.msra.mxu0 %v1718_v21 }
 0xc5e   : > { %v1695_v4 = vpop.f32.mrb[40].mxu1 }
 0xc5f   : > { %v2253_v5 = vpop.f32.mrb[41].mxu1  ;;  %v1701_v6 = vsel %vm600_vm2, %v1695_v4, -inf }
 0xc60   : > { %1702 = vmax.xlane.f32.xlu0 %v1701_v6  ;;  %v1698_v9 = vpop.f32.mrb[42].mxu1 }
 0xc61   : > { %v2254_v10 = vpop.f32.mrb[43].mxu1 }
 0xced   : > { %v1703_v11 = vpop.xlane.xlu0 %1702 }
 0xcee   : > { %v1704_v12 = vsub.f32 %v1695_v4, %v1703_v11 }
 0xcf0   : > { %v1705_v13 = vmul.f32 1.442695, %v1704_v12 }
 0xcf2   : > { %2360 = vpow2.f32 %v1705_v13 }
 0xcfc   : > { %v2361_v14 = vpop.eup %2360 }
 0xcfd   : > { %v1707_v15 = vsel %vm600_vm2, %v2361_v14, 0.0 }
 0xcfe   : > { %1708 = vadd.xlane.f32.xlu1 %v1707_v15 }
 0xd8b   : > { %v1709_v24 = vpop.xlane.xlu1 %1708 }
 0xd8c   : > { %2362 = vrcp.f32 %v1709_v24 }
 0xd96   : > { %v2363_v25 = vpop.eup %2362 }
 0xd97   : > { %v1711_v26 = vmul.f32 %v2363_v25, %v2361_v14 }
 0xd99   : > { %v1712_v27 = vpack.c.bf16 %v1711_v26, %v1711_v26 }
 0xd9b   : > { %2258 = vmatmul.mubr.msk.bf16.vlgmr.msra.gmra.mrb[44].mxu0 %vm600_vm2, %v1712_v27 }
 0xe6e   : > { %v1754_v28 = vpop.f32.mrb[44].mxu0 }
 0xe6f   : > { %v1760_v29 = vpack.c.bf16 %v1754_v28, %v1754_v28  ;;  %v2259_v30 = vpop.f32.mrb[45].mxu0 }
 0xe70   : > { %v1757_v31 = vpop.f32.mrb[46].mxu0 }
 0xe71   : > { %v2260_v32 = vpop.f32.mrb[47].mxu0  ;;  %2264 = vmatmul.mubr.msk.bf16.vlgmr.msra.gmra.mrb[44].mxu1 %vm600_vm2, %v1760_v29 }
 0xf44   : > { %v1803_v33 = vpop.f32.mrb[44].mxu1 }
 0xf45   : > { %v1809_v35 = vadd.f32 %v1803_v33, %v2801_v50  ;;  %v2265_v36 = vpop.f32.mrb[45].mxu1 }
 0xf46   : > { %v1806_v37 = vpop.f32.mrb[46].mxu1 }
 0xf47   : > { %v1817_v38 = vadd.f32 %v2034_v34, %v1809_v35  ;;  %v2266_v39 = vpop.f32.mrb[47].mxu1 }
 0xf49   : > { %1819 = vst.msk [vmem:[%s385_s30] sm:$0xff] %vm1818_vm4, %v1817_v38 }
 0xf4a   : > { %2377 = shalt.err (!%p2374_p5)
}
 0xf4b   : > { %s2378_s22 = scalar_lea.hbm %s2847_s20, 128  ;;  %s2382_s12 = scalar_lea.hbm %s2904_s10, 256 }
 0xf4c   : > { %p2379_p6 = scmp.ne.s32.totalorder %s2847_s20, %s2378_s22  ;;  %p2383_p10 = scmp.lt.u32.totalorder %s2847_s20, %s2904_s10 }
 0xf4d   : > { %p2384_p11 = scmp.lt.u32.totalorder %s2382_s12, %s2378_s22  ;;  %p2386_p13 = scmp.lt.u32.totalorder %s2378_s22, %s2847_s20 }
 0xf4e   : > { %p2380_p7 = pnand %p2379_p6, %p2542_p4 }
 0xf4f   : > { %p2385_p12 = por %p2384_p11, %p2383_p10 }
 0xf50   : > { %p2381_p9 = pneg %p2380_p7 }
 0xf51   : > { %p2387_p0 = por %p2386_p13, %p2385_p12 }
 0xf53   : > { %p2388_p1 = pnand %p2387_p0, %p2381_p9 }
 0xf55   : > { %2391 = shalt.err (!%p2388_p1)
}
 0xf56   : > { %2267 = dma.vmem_to_hbm [thread:$0]  (%p2542_p4), %s2849_s11, 128, %s2847_s20, %s1821_s16  }
 0xf57 PF: > { %p2273_p2 = scmp.ge.s32.totalorder %s2442_s18, 2  ;;  %s1847_s0 = sand.u32 1, %s2422_s13  }
 0xf58   : > { %s1848_s24 = scalar_lea.sflag [#allocation3], %s1847_s0 }
 0xf59   : > { %p2270_p3 = pnand %p2273_p2, %p2549_p8 }
 0xf5b   : > { %2417 = dma.done.wait (!%p2270_p3), %s1848_s24, 128  }
 0xf5c   : > { %2419 = vsyncadd (!%p2270_p3), %s1848_s24, 4294967168  ;;  %s23_s18 = sadd.s32 1, %s2442_s18   ;;  %s2909_s13 = smov %s2426_s14 }
 0xf5d   : > { %p20_p5 = scmp.ge.s32.totalorder %s23_s18, 4   ;;  %s2910_s14 = smov %s2430_s15 }
 0xf5e   : > { %s2911_s15 = smov %s2555_s26  ;;  %s2912_s16 = smov %s2438_s17 }
 0xf5f   : > { %s2913_s17 = smov %s2915_s21  ;;  %22 = sbr.rel (!%p20_p5) target bundleno = 6 (0x6), region = 119 }
 0xf66   :  { %1853 = vsyncpa [#allocation3], 1 }
 0xf67   :  { %1855 = vsyncpa [#allocation3 + $0x1], 1 }

</bundles_post_ra>
